<compile_context>
chip_gen: v7x
topology: tpu7x:2x2x1
jax: 0.10.0
libtpu: 0.0.40
codegen_flags: <defaults>
</compile_context>

<pallas_src>
import functools

import jax
import jax.numpy as jnp
from jax.experimental import pallas as pl
from jax.experimental.pallas import tpu as pltpu


def _mish_fast(x):
    """mish(x) = x * tanh(softplus(x)) via 1 exp + 1 divide (exact in f32).

    With t = e^x:  tanh(log(1+t)) = t(t+2) / (t(t+2) + 2)   (no cancellation)
    Clamp x at 30 before exp: for x >= 30 the gate is 1.0 in f32 anyway.
    """
    t = jnp.exp(jnp.minimum(x, 30.0))
    u = t * (t + 2.0)
    return x * u / (u + 2.0)


def koopman_fwd_kernel(x_ref, *refs, nx, nz_enc, n_linear):
    """Fused encoder-MLP + concat kernel (one batch tile per grid step).

    refs = (w_0, b_0, ..., w_{L-1}, b_{L-1}, out_ref)
      x_ref  : (TILE_B, nx)       input states tile
      w_i    : (d_i, d_{i+1})     linear weight (transposed vs torch)
      b_i    : (1, d_{i+1})       linear bias
      out_ref: (TILE_B, nz)       output latent tile z = [x, encoder(x)]
    """
    out_ref = refs[-1]
    x = x_ref[...]

    # Passthrough slab store FIRST: retires x before the matmuls so it is not
    # kept live across the whole MLP (avoids vreg spills at large tiles).
    out_ref[:, pl.ds(0, nx)] = x.astype(out_ref.dtype)

    h = x
    for i in range(n_linear):
        w = refs[2 * i][...]
        b = refs[2 * i + 1][...]
        h = jnp.dot(h, w, preferred_element_type=jnp.float32) + b
        if i < n_linear - 1:          # activation on all but the last layer
            h = _mish_fast(h)

    out_ref[:, pl.ds(nx, nz_enc)] = h.astype(out_ref.dtype)


def _pick_tiling(B, tile_b_req):
    """Pick (tile_b, num_tiles, padded_B).

    Prefers a multiple-of-8 divisor of B (no pad/slice HBM passes) capped at
    B//2 so the grid has >= 2 steps (megacore sharding + per-core pipelining).
    Falls back to padding when B is ragged or only tiny divisors exist.
    """
    tile_b_req = max(8, (tile_b_req // 8) * 8)      # sublane constraint
    if B % 8 == 0:
        cap = min(tile_b_req, B)
        if B >= 16:
            cap = min(cap, max(8, (B // 2) // 8 * 8))
        floor = max(8, cap // 8)                    # don't accept tiny tiles
        d = cap
        while d >= floor:
            if B % d == 0:
                return d, B // d, B                 # exact tiling, no padding
            d -= 8
    # Ragged / awkward batch: pad (extra HBM pass, acceptable fallback).
    # TODO(synk): a masked final tile would avoid the pad/slice copies here.
    tile_b = min(tile_b_req, ((B + 7) // 8) * 8)
    num_tiles = (B + tile_b - 1) // tile_b
    return tile_b, num_tiles, num_tiles * tile_b


def koopman_forward(x, params, *, tile_b=4096):
    """KoopmanAutoencoder.forward for a (B, nx) batch -> (B, nz).

    params: list of (w, b) for the encoder MLP; w is (in, out), b is (1, out).
    """
    B, nx = x.shape
    n_linear = len(params)
    nz_enc = params[-1][0].shape[1]
    nz = nx + nz_enc

    tile_b, num_tiles, b_pad = _pick_tiling(B, tile_b)
    x_in = x if b_pad == B else jnp.pad(x, ((0, b_pad - B), (0, 0)))

    # BlockSpecs: x/out streamed over the batch grid, params VMEM-resident.
    in_specs = [pl.BlockSpec((tile_b, nx), lambda i: (i, 0))]
    flat_params = []
    for (w, b) in params:
        kin, kout = w.shape
        in_specs.append(pl.BlockSpec((kin, kout), lambda i: (0, 0)))
        in_specs.append(pl.BlockSpec((1, kout), lambda i: (0, 0)))
        flat_params += [w, b]

    # Lane-padded, double-buffered VMEM footprint estimate (x + out streams).
    ceil8 = lambda n: ((n + 7) // 8) * 8
    pad128 = lambda n: ((n + 127) // 128) * 128
    stream_bytes = 2 * 4 * tile_b * (pad128(nx) + pad128(nz))
    weight_bytes = 4 * sum(ceil8(w.shape[0]) * pad128(w.shape[1])
                           + 8 * pad128(b.shape[1]) for w, b in params)
    vmem_need = stream_bytes + weight_bytes

    compiler_kwargs = dict(dimension_semantics=("parallel",))
    if vmem_need > (12 << 20):
        # Exceeds the v5e default 16 MiB scoped limit; request more headroom
        # while staying well under v7x's 64 MiB physical VMEM.
        compiler_kwargs["vmem_limit_bytes"] = int(min(2 * vmem_need, 56 << 20))

    flops = sum(2 * b_pad * w.shape[0] * w.shape[1] for w, _ in params)
    trans = sum(b_pad * w.shape[1] for w, _ in params[:-1])
    cost = pl.CostEstimate(
        flops=flops,
        transcendentals=trans,
        bytes_accessed=4 * (b_pad * nx + b_pad * nz
                            + sum(w.size + b.size for w, b in params)),
    )

    kernel = functools.partial(
        koopman_fwd_kernel, nx=nx, nz_enc=nz_enc, n_linear=n_linear)

    out = pl.pallas_call(
        kernel,
        out_shape=jax.ShapeDtypeStruct((b_pad, nz), x.dtype),
        grid_spec=pltpu.PrefetchScalarGridSpec(
            num_scalar_prefetch=0,
            grid=(num_tiles,),
            in_specs=in_specs,
            out_specs=pl.BlockSpec((tile_b, nz), lambda i: (i, 0)),
        ),
        compiler_params=pltpu.CompilerParams(**compiler_kwargs),
        cost_estimate=cost,
    )(x_in, *flat_params)

    return out if b_pad == B else out[:B]


# ----------------------------- test harness ---------------------------------

def xavier_uniform(key, shape, dtype=jnp.float32):
    """Same formula as torch.nn.init.xavier_uniform_ on an (in, out) matrix."""
    fan_in, fan_out = shape[0], shape[1]
    limit = jnp.sqrt(6.0 / (fan_in + fan_out))
    return jax.random.uniform(key, shape, dtype, minval=-limit, maxval=limit)


def make_params(key, nx, nz, hidden_dims):
    """Deterministic parameters for the encoder MLP (dims = [nx] + hidden + [nz-nx])."""
    dims = [nx] + list(hidden_dims) + [nz - nx]
    keys = jax.random.split(key, 2 * (len(dims) - 1))
    params = []
    for i in range(len(dims) - 1):
        w = xavier_uniform(keys[2 * i], (dims[i], dims[i + 1]))          # (in, out)
        b = 0.01 * jax.random.normal(keys[2 * i + 1], (1, dims[i + 1]))  # (1, out)
        params.append((w, b))
    return params


def reference_forward(x, params):
    """Pure-JAX reference of KoopmanAutoencoder.forward (canonical Mish)."""
    h = x
    for i, (w, b) in enumerate(params):
        h = h @ w + b
        if i < len(params) - 1:
            h = h * jnp.tanh(jax.nn.softplus(h))
    return jnp.concatenate([x, h], axis=-1)


if __name__ == "__main__":
    # Shapes consistent with the module: nx < nz, single hidden layer encoder.
    # B = 1000 exercises the no-pad divisor tiling path (tile_b=200, 5 tiles).
    B, nx, nu, nz, H = 1000, 8, 2, 16, 8
    hidden_dims = [32]

    key = jax.random.PRNGKey(0)
    kx, kp = jax.random.split(key)
    x = jax.random.normal(kx, (B, nx), dtype=jnp.float32)

    params = make_params(kp, nx, nz, hidden_dims)

    # NOTE: A (nz,nz), B (nz,nu), Cs (nu,nz,nz), P (nx,nz) belong to the
    # dynamics / loss, not forward(); forward() only uses the encoder MLP.
    # TODO(synk): predict_z_next / loss rollout are training-time methods and
    # are intentionally not implemented here.

    out = koopman_forward(x, params)
    out = jax.block_until_ready(out)

    ref = reference_forward(x, params)
    assert out.shape == (B, nz), out.shape
    assert jnp.allclose(out, ref, atol=1e-4, rtol=1e-4), float(
        jnp.max(jnp.abs(out - ref)))

    print("KERNEL_OK")
</pallas_src>

<mosaic_0001>
module attributes {stable_mosaic.version = 11 : i64} {
  func.func @koopman_fwd_kernel(%arg0: i32, %arg1: memref<200x8xf32, #tpu.memory_space<vmem>>, %arg2: memref<8x32xf32, #tpu.memory_space<vmem>>, %arg3: memref<1x32xf32, #tpu.memory_space<vmem>>, %arg4: memref<32x8xf32, #tpu.memory_space<vmem>>, %arg5: memref<1x8xf32, #tpu.memory_space<vmem>>, %arg6: memref<200x16xf32, #tpu.memory_space<vmem>>) attributes {dimension_semantics = [#tpu.dimension_semantics<parallel>], iteration_bounds = array<i64: 5>, scalar_prefetch = 0 : i64, scratch_operands = 0 : i64, tpu.core_type = #tpu.core_type<tc>, window_params = [{transform_indices = @transform_0, window_bounds = array<i64: 200, 8>}, {pipeline_mode = #tpu.pipeline_mode<synchronous>, transform_indices = @transform_1, window_bounds = array<i64: 8, 32>}, {pipeline_mode = #tpu.pipeline_mode<synchronous>, transform_indices = @transform_2, window_bounds = array<i64: 1, 32>}, {pipeline_mode = #tpu.pipeline_mode<synchronous>, transform_indices = @transform_3, window_bounds = array<i64: 32, 8>}, {pipeline_mode = #tpu.pipeline_mode<synchronous>, transform_indices = @transform_4, window_bounds = array<i64: 1, 8>}, {transform_indices = @transform_5, window_bounds = array<i64: 200, 16>}]} {
    %c0 = arith.constant 0 : index
    %c0_0 = arith.constant 0 : index
    %0 = vector.load %arg1[%c0, %c0_0] : memref<200x8xf32, #tpu.memory_space<vmem>>, vector<200x8xf32>
    %c0_1 = arith.constant 0 : index
    %c0_2 = arith.constant 0 : index
    %1 = vector.load %arg6[%c0_1, %c0_2] : memref<200x16xf32, #tpu.memory_space<vmem>>, vector<200x8xf32>
    tpu.vector_store %arg6[%c0_1, %c0_2], %0 {strides = array<i32>} : memref<200x16xf32, #tpu.memory_space<vmem>>, vector<200x8xf32>,
    %c0_3 = arith.constant 0 : index
    %c0_4 = arith.constant 0 : index
    %2 = vector.load %arg2[%c0_3, %c0_4] : memref<8x32xf32, #tpu.memory_space<vmem>>, vector<8x32xf32>
    %c0_5 = arith.constant 0 : index
    %c0_6 = arith.constant 0 : index
    %3 = vector.load %arg3[%c0_5, %c0_6] : memref<1x32xf32, #tpu.memory_space<vmem>>, vector<1x32xf32>
    %cst = arith.constant dense<0.000000e+00> : vector<200x32xf32>
    %4 = tpu.matmul %0, %2, %cst {dimension_numbers = #tpu.dot_dimension_numbers<[1], [0], [0], [1], [0, 0, 1, 1], [], []>} : vector<200x8xf32>, vector<8x32xf32>, vector<200x32xf32> -> vector<200x32xf32>
    %5 = vector.broadcast %3 : vector<1x32xf32> to vector<200x32xf32>
    %6 = arith.addf %4, %5 : vector<200x32xf32>
    %cst_7 = arith.constant 3.000000e+01 : f32
    %7 = vector.broadcast %cst_7 : f32 to vector<200x32xf32>
    %8 = arith.minimumf %6, %7 : vector<200x32xf32>
    %9 = math.exp %8 : vector<200x32xf32>
    %cst_8 = arith.constant 2.000000e+00 : f32
    %10 = vector.broadcast %cst_8 : f32 to vector<200x32xf32>
    %11 = arith.addf %9, %10 : vector<200x32xf32>
    %12 = arith.mulf %9, %11 : vector<200x32xf32>
    %13 = arith.mulf %6, %12 : vector<200x32xf32>
    %cst_9 = arith.constant 2.000000e+00 : f32
    %14 = vector.broadcast %cst_9 : f32 to vector<200x32xf32>
    %15 = arith.addf %12, %14 : vector<200x32xf32>
    %16 = arith.divf %13, %15 : vector<200x32xf32>
    %c0_10 = arith.constant 0 : index
    %c0_11 = arith.constant 0 : index
    %17 = vector.load %arg4[%c0_10, %c0_11] : memref<32x8xf32, #tpu.memory_space<vmem>>, vector<32x8xf32>
    %c0_12 = arith.constant 0 : index
    %c0_13 = arith.constant 0 : index
    %18 = vector.load %arg5[%c0_12, %c0_13] : memref<1x8xf32, #tpu.memory_space<vmem>>, vector<1x8xf32>
    %cst_14 = arith.constant dense<0.000000e+00> : vector<200x8xf32>
    %19 = tpu.matmul %16, %17, %cst_14 {dimension_numbers = #tpu.dot_dimension_numbers<[1], [0], [0], [1], [0, 0, 1, 1], [], []>} : vector<200x32xf32>, vector<32x8xf32>, vector<200x8xf32> -> vector<200x8xf32>
    %20 = vector.broadcast %18 : vector<1x8xf32> to vector<200x8xf32>
    %21 = arith.addf %19, %20 : vector<200x8xf32>
    %c0_15 = arith.constant 0 : index
    %c8 = arith.constant 8 : index
    %22 = vector.load %arg6[%c0_15, %c8] : memref<200x16xf32, #tpu.memory_space<vmem>>, vector<200x8xf32>
    tpu.vector_store %arg6[%c0_15, %c8], %21 {strides = array<i32>} : memref<200x16xf32, #tpu.memory_space<vmem>>, vector<200x8xf32>,
    return
  }
  func.func @transform_0(%arg0: i32) -> (i32, i32) {
    %c0_i32 = arith.constant 0 : i32
    %c0_i32_0 = arith.constant 0 : i32
    return %arg0, %c0_i32 : i32, i32
  }
  func.func @transform_1(%arg0: i32) -> (i32, i32) {
    %c0_i32 = arith.constant 0 : i32
    %c0_i32_0 = arith.constant 0 : i32
    %c0_i32_1 = arith.constant 0 : i32
    return %c0_i32, %c0_i32_0 : i32, i32
  }
  func.func @transform_2(%arg0: i32) -> (i32, i32) {
    %c0_i32 = arith.constant 0 : i32
    %c0_i32_0 = arith.constant 0 : i32
    %c0_i32_1 = arith.constant 0 : i32
    return %c0_i32, %c0_i32_0 : i32, i32
  }
  func.func @transform_3(%arg0: i32) -> (i32, i32) {
    %c0_i32 = arith.constant 0 : i32
    %c0_i32_0 = arith.constant 0 : i32
    %c0_i32_1 = arith.constant 0 : i32
    return %c0_i32, %c0_i32_0 : i32, i32
  }
  func.func @transform_4(%arg0: i32) -> (i32, i32) {
    %c0_i32 = arith.constant 0 : i32
    %c0_i32_0 = arith.constant 0 : i32
    %c0_i32_1 = arith.constant 0 : i32
    return %c0_i32, %c0_i32_0 : i32, i32
  }
  func.func @transform_5(%arg0: i32) -> (i32, i32) {
    %c0_i32 = arith.constant 0 : i32
    %c0_i32_0 = arith.constant 0 : i32
    return %arg0, %c0_i32 : i32, i32
  }
}

</mosaic_0001>

<bundles_post_ra>
// kernel: tpu_custom_call.1
= control target key start
LH: loop header
LB: loop body
LE: loop exit
PB: predicated region body
PF: predicated region fallthrough
CT: control target
= control target key end

     0   :  { %s1672_s18 = smov 0   ;;  %s2169_s0 = inlined_call_operand.vmem [shape: f32[1000,8], index: 0, kind: input, shape index: {}]   ;;  %s2170_s1 = inlined_call_operand.vmem [shape: f32[8,32], index: 1, kind: input, shape index: {}]   ;;  %s2171_s2 = inlined_call_operand.vmem [shape: f32[1,32], index: 2, kind: input, shape index: {}]   ;;  %s2172_s3 = inlined_call_operand.vmem [shape: f32[32,8], index: 3, kind: input, shape index: {}]   ;;  %s2173_s4 = inlined_call_operand.vmem [shape: f32[1,8], index: 4, kind: input, shape index: {}]   ;;  %s2174_s5 = inlined_call_operand.vmem [shape: f32[1000,16], index: 5, kind: output, shape index: {}]  }
   0x1 LB: > { %s1236_s19 = sadd.s32 4294967295, %s1636_s18   ;;  %p1240_p0 = scmp.ge.s32.totalorder %s1636_s18, 1  ;;  %s1636_s18 = sphi %s1672_s18, %s15_s18  }
   0x2   : > { %p188_p1 = scmp.lt.s32.totalorder %s1636_s18, 6 }
   0x4   : > { %p189_p2 = pnand %p1240_p0, %p188_p1 }
   0x5   : > { %v279_v0 = vld [vmem:[%s2170_s1] sm:$0xff] (!%p189_p2)  ;;  %s216_s22 = smul.u32 (!%p189_p2), 25, %s1236_s19  ;;  %v1638_v1 = vmov (!%p189_p2), 0.0   ;;  %vm1639_vm0 = vmmov (!%p189_p2), 0   ;;  %vm253_vm1 = vcmask (!%p189_p2), 64512   ;;  %v778_v28 = vld [vmem:[%s2172_s3 + $0x8] sm:$0xff] (!%p189_p2) }
   0x6   : > { %192 = sbr.rel (%p189_p2) target bundleno = 691 (0x2b3), region = 40  ;;  %1352 = vmatprep.subr.mxu0 (!%p189_p2), %v1638_v1  ;;  %1354 = vmatprep.mubr.msk.f32.mxu0 (!%p189_p2), %vm1639_vm0, %v1638_v1  ;;  %v777_v27 = vld [vmem:[%s2172_s3] sm:$0xff] (!%p189_p2)  ;;  %v1640_v30 = vmov (!%p189_p2), 0.0|0.0   ;;  %v779_v31 = vld [vmem:[%s2172_s3 + $0x10] sm:$0xff] (!%p189_p2)  ;;  %v780_v32 = vld [vmem:[%s2172_s3 + $0x18] sm:$0xff] (!%p189_p2)  ;;  %vm788_vm2 = vcmask (!%p189_p2), 261120  }
   0x7   : > { %1353 = vmatpush3.msra.mxu0 (!%p189_p2), %v279_v0  ;;  %p217_p3 = scmp.lt.s32.totalorder (!%p189_p2), %s216_s22, 124  ;;  %1437 = vmatprep.mubr.msk.f32.mxu1 (!%p189_p2), %vm1639_vm0, %v1638_v1  ;;  %v1513_v29 = vpack.c.bf16 (!%p189_p2), %v778_v28, %v777_v27  ;;  %v1516_v33 = vpack.c.bf16 (!%p189_p2), %v780_v32, %v779_v31  ;;  %v1861_v34 = vld [vmem:[%s2171_s2] ss:$0 sm:$0xff] (!%p189_p2)  ;;  %s1641_s17 = smov (!%p189_p2), 8   ;;  %vm1154_vm3 = vcmask (!%p189_p2), 130112  }
   0x8   : > { %1512 = vmatprep.subr.bf16.mxu1 (!%p189_p2), %v1640_v30 }
   0x9   : > { %1514 = vmatpush3.bf16.msra.mxu1 (!%p189_p2), %v1513_v29 }
   0xa   : > { %1515 = vmatprep.subr.bf16.mxu1 (!%p189_p2), %v1640_v30 }
   0xd   : > { %s2176_s22 = smov (!%p217_p3, %s216_s22), 124  ;;  %1517 = vmatpush3.bf16.msra.mxu1 %v1516_v33 }
   0xe   : > { %s1241_s23 = sshll.u32 %s2176_s22, 3 }
   0xf   : > { %s1691_s26 = scalar_lea.vmem %s2169_s0, %s1241_s23  ;;  %s1696_s29 = scalar_lea.vmem %s2174_s5, %s1241_s23 }
  0x10   : > { %v228_v2 = vld [vmem:[%s1691_s26] sm:$0xff]  ;;  %v229_v3 = vld [vmem:[%s1691_s26 + $0x8] sm:$0xff]  ;;  %v230_v4 = vld [vmem:[%s1691_s26 + $0x10] sm:$0xff] }
  0x11   : > { %254 = vst.msk [vmem:[%s1696_s29] sm:$0xff] %vm253_vm1, %v228_v2  ;;  %1355 = vmatmul.mubr.msk.f32.vlgmr.msra.gmra.mrb[0].mxu0 %vm253_vm1, %v228_v2  ;;  %255 = vst.msk [vmem:[%s1696_s29 + $0x8] sm:$0xff] %vm253_vm1, %v229_v3  ;;  %v231_v5 = vld [vmem:[%s1691_s26 + $0x18] sm:$0xff]  ;;  %v232_v6 = vld [vmem:[%s1691_s26 + $0x20] sm:$0xff] }
  0x12   : > { %256 = vst.msk [vmem:[%s1696_s29 + $0x10] sm:$0xff] %vm253_vm1, %v230_v4  ;;  %v233_v7 = vld [vmem:[%s1691_s26 + $0x28] sm:$0xff]  ;;  %1357 = vmatprep.mubr.msk.f32.mxu0 %vm1639_vm0, %v1638_v1  ;;  %257 = vst.msk [vmem:[%s1696_s29 + $0x18] sm:$0xff] %vm253_vm1, %v231_v5  ;;  %v234_v8 = vld [vmem:[%s1691_s26 + $0x30] sm:$0xff] }
  0x13   : > { %258 = vst.msk [vmem:[%s1696_s29 + $0x20] sm:$0xff] %vm253_vm1, %v232_v6  ;;  %259 = vst.msk [vmem:[%s1696_s29 + $0x28] sm:$0xff] %vm253_vm1, %v233_v7  ;;  %v235_v9 = vld [vmem:[%s1691_s26 + $0x38] sm:$0xff]  ;;  %v236_v10 = vld [vmem:[%s1691_s26 + $0x40] sm:$0xff] }
  0x14   : > { %260 = vst.msk [vmem:[%s1696_s29 + $0x30] sm:$0xff] %vm253_vm1, %v234_v8  ;;  %261 = vst.msk [vmem:[%s1696_s29 + $0x38] sm:$0xff] %vm253_vm1, %v235_v9  ;;  %v237_v11 = vld [vmem:[%s1691_s26 + $0x48] sm:$0xff]  ;;  %v238_v12 = vld [vmem:[%s1691_s26 + $0x50] sm:$0xff] }
  0x15   : > { %262 = vst.msk [vmem:[%s1696_s29 + $0x40] sm:$0xff] %vm253_vm1, %v236_v10  ;;  %v239_v13 = vld [vmem:[%s1691_s26 + $0x58] sm:$0xff]  ;;  %263 = vst.msk [vmem:[%s1696_s29 + $0x48] sm:$0xff] %vm253_vm1, %v237_v11  ;;  %v240_v14 = vld [vmem:[%s1691_s26 + $0x60] sm:$0xff]  ;;  %1358 = vmatmul.mubr.msk.f32.gmra.mrb[2].mxu0 %vm253_vm1, %v229_v3 }
  0x16   : > { %264 = vst.msk [vmem:[%s1696_s29 + $0x50] sm:$0xff] %vm253_vm1, %v238_v12  ;;  %265 = vst.msk [vmem:[%s1696_s29 + $0x58] sm:$0xff] %vm253_vm1, %v239_v13  ;;  %v241_v15 = vld [vmem:[%s1691_s26 + $0x68] sm:$0xff]  ;;  %v242_v16 = vld [vmem:[%s1691_s26 + $0x70] sm:$0xff]  ;;  %1360 = vmatprep.mubr.msk.f32.mxu0 %vm1639_vm0, %v1638_v1 }
  0x17   : > { %266 = vst.msk [vmem:[%s1696_s29 + $0x60] sm:$0xff] %vm253_vm1, %v240_v14  ;;  %267 = vst.msk [vmem:[%s1696_s29 + $0x68] sm:$0xff] %vm253_vm1, %v241_v15  ;;  %v243_v17 = vld [vmem:[%s1691_s26 + $0x78] sm:$0xff]  ;;  %v244_v18 = vld [vmem:[%s1691_s26 + $0x80] sm:$0xff] }
  0x18   : > { %268 = vst.msk [vmem:[%s1696_s29 + $0x70] sm:$0xff] %vm253_vm1, %v242_v16  ;;  %v245_v19 = vld [vmem:[%s1691_s26 + $0x88] sm:$0xff]  ;;  %269 = vst.msk [vmem:[%s1696_s29 + $0x78] sm:$0xff] %vm253_vm1, %v243_v17  ;;  %v246_v20 = vld [vmem:[%s1691_s26 + $0x90] sm:$0xff] }
  0x19   : > { %270 = vst.msk [vmem:[%s1696_s29 + $0x80] sm:$0xff] %vm253_vm1, %v244_v18  ;;  %271 = vst.msk [vmem:[%s1696_s29 + $0x88] sm:$0xff] %vm253_vm1, %v245_v19  ;;  %v247_v21 = vld [vmem:[%s1691_s26 + $0x98] sm:$0xff]  ;;  %v248_v22 = vld [vmem:[%s1691_s26 + $0xa0] sm:$0xff]  ;;  %1361 = vmatmul.mubr.msk.f32.gmra.mrb[4].mxu0 %vm253_vm1, %v230_v4 }
  0x1a   : > { %272 = vst.msk [vmem:[%s1696_s29 + $0x90] sm:$0xff] %vm253_vm1, %v246_v20  ;;  %273 = vst.msk [vmem:[%s1696_s29 + $0x98] sm:$0xff] %vm253_vm1, %v247_v21  ;;  %v249_v23 = vld [vmem:[%s1691_s26 + $0xa8] sm:$0xff]  ;;  %v250_v24 = vld [vmem:[%s1691_s26 + $0xb0] sm:$0xff]  ;;  %1363 = vmatprep.mubr.msk.f32.mxu0 %vm1639_vm0, %v1638_v1 }
  0x1b   : > { %274 = vst.msk [vmem:[%s1696_s29 + $0xa0] sm:$0xff] %vm253_vm1, %v248_v22  ;;  %v251_v25 = vld [vmem:[%s1691_s26 + $0xb8] sm:$0xff]  ;;  %275 = vst.msk [vmem:[%s1696_s29 + $0xa8] sm:$0xff] %vm253_vm1, %v249_v23  ;;  %v252_v26 = vld [vmem:[%s1691_s26 + $0xc0] sm:$0xff] }
  0x1c   : > { %276 = vst.msk [vmem:[%s1696_s29 + $0xb0] sm:$0xff] %vm253_vm1, %v250_v24  ;;  %277 = vst.msk [vmem:[%s1696_s29 + $0xb8] sm:$0xff] %vm253_vm1, %v251_v25 }
  0x1d   : > { %278 = vst.msk [vmem:[%s1696_s29 + $0xc0] sm:$0xff] %vm253_vm1, %v252_v26  ;;  %1364 = vmatmul.mubr.msk.f32.gmra.mrb[6].mxu0 %vm253_vm1, %v231_v5 }
  0x1e   : > { %1366 = vmatprep.mubr.msk.f32.mxu0 %vm1639_vm0, %v1638_v1 }
  0x21   : > { %1367 = vmatmul.mubr.msk.f32.gmra.mrb[8].mxu0 %vm253_vm1, %v232_v6 }
  0x22   : > { %1369 = vmatprep.mubr.msk.f32.mxu0 %vm1639_vm0, %v1638_v1 }
  0x25   : > { %1370 = vmatmul.mubr.msk.f32.gmra.mrb[10].mxu0 %vm253_vm1, %v233_v7 }
  0x26   : > { %1372 = vmatprep.mubr.msk.f32.mxu0 %vm1639_vm0, %v1638_v1 }
  0x29   : > { %1373 = vmatmul.mubr.msk.f32.gmra.mrb[12].mxu0 %vm253_vm1, %v234_v8 }
  0x2a   : > { %1375 = vmatprep.mubr.msk.f32.mxu0 %vm1639_vm0, %v1638_v1 }
  0x2d   : > { %1376 = vmatmul.mubr.msk.f32.gmra.mrb[14].mxu0 %vm253_vm1, %v235_v9 }
  0x2e   : > { %1378 = vmatprep.mubr.msk.f32.mxu0 %vm1639_vm0, %v1638_v1 }
  0x31   : > { %1379 = vmatmul.mubr.msk.f32.gmra.mrb[16].mxu0 %vm253_vm1, %v236_v10 }
  0x32   : > { %1381 = vmatprep.mubr.msk.f32.mxu0 %vm1639_vm0, %v1638_v1 }
  0x35   : > { %1382 = vmatmul.mubr.msk.f32.gmra.mrb[18].mxu0 %vm253_vm1, %v237_v11 }
  0x36   : > { %1384 = vmatprep.mubr.msk.f32.mxu0 %vm1639_vm0, %v1638_v1 }
  0x39   : > { %1385 = vmatmul.mubr.msk.f32.gmra.mrb[20].mxu0 %vm253_vm1, %v238_v12 }
  0x3a   : > { %1387 = vmatprep.mubr.msk.f32.mxu0 %vm1639_vm0, %v1638_v1 }
  0x3d   : > { %1388 = vmatmul.mubr.msk.f32.gmra.mrb[22].mxu0 %vm253_vm1, %v239_v13 }
  0x3e   : > { %1390 = vmatprep.mubr.msk.f32.mxu0 %vm1639_vm0, %v1638_v1 }
  0x41   : > { %1391 = vmatmul.mubr.msk.f32.gmra.mrb[24].mxu0 %vm253_vm1, %v240_v14 }
  0x42   : > { %1393 = vmatprep.mubr.msk.f32.mxu0 %vm1639_vm0, %v1638_v1 }
  0x45   : > { %1394 = vmatmul.mubr.msk.f32.gmra.mrb[26].mxu0 %vm253_vm1, %v241_v15 }
  0x46   : > { %1396 = vmatprep.mubr.msk.f32.mxu0 %vm1639_vm0, %v1638_v1 }
  0x49   : > { %1397 = vmatmul.mubr.msk.f32.gmra.mrb[28].mxu0 %vm253_vm1, %v242_v16 }
  0x4a   : > { %1399 = vmatprep.mubr.msk.f32.mxu0 %vm1639_vm0, %v1638_v1 }
  0x4d   : > { %1400 = vmatmul.mubr.msk.f32.gmra.mrb[30].mxu0 %vm253_vm1, %v243_v17 }
  0x4e   : > { %1402 = vmatprep.mubr.msk.f32.mxu0 %vm1639_vm0, %v1638_v1 }
  0x51   : > { %1403 = vmatmul.mubr.msk.f32.gmra.mrb[32].mxu0 %vm253_vm1, %v244_v18 }
  0x52   : > { %1405 = vmatprep.mubr.msk.f32.mxu0 %vm1639_vm0, %v1638_v1 }
  0x55   : > { %1406 = vmatmul.mubr.msk.f32.gmra.mrb[34].mxu0 %vm253_vm1, %v245_v19 }
  0x56   : > { %1408 = vmatprep.mubr.msk.f32.mxu0 %vm1639_vm0, %v1638_v1 }
  0x59   : > { %1409 = vmatmul.mubr.msk.f32.gmra.mrb[36].mxu0 %vm253_vm1, %v246_v20 }
  0x5a   : > { %1411 = vmatprep.mubr.msk.f32.mxu0 %vm1639_vm0, %v1638_v1 }
  0x5d   : > { %1412 = vmatmul.mubr.msk.f32.gmra.mrb[38].mxu0 %vm253_vm1, %v247_v21 }
  0x5e   : > { %1414 = vmatprep.mubr.msk.f32.mxu0 %vm1639_vm0, %v1638_v1 }
  0x61   : > { %1415 = vmatmul.mubr.msk.f32.gmra.mrb[40].mxu0 %vm253_vm1, %v248_v22 }
  0x62   : > { %1417 = vmatprep.mubr.msk.f32.mxu0 %vm1639_vm0, %v1638_v1 }
  0x65   : > { %1418 = vmatmul.mubr.msk.f32.gmra.mrb[42].mxu0 %vm253_vm1, %v249_v23 }
  0x66   : > { %1420 = vmatprep.mubr.msk.f32.mxu0 %vm1639_vm0, %v1638_v1 }
  0x69   : > { %1421 = vmatmul.mubr.msk.f32.gmra.mrb[44].mxu0 %vm253_vm1, %v250_v24 }
  0x6a   : > { %1423 = vmatprep.mubr.msk.f32.mxu0 %vm1639_vm0, %v1638_v1 }
  0x6d   : > { %1424 = vmatmul.mubr.msk.f32.gmra.mrb[46].mxu0 %vm253_vm1, %v251_v25 }
  0x6e   : > { %1426 = vmatprep.mubr.msk.f32.mxu0 %vm1639_vm0, %v1638_v1 }
  0x71   : > { %1427 = vmatmul.mubr.msk.f32.gmra.mrb[48].mxu0 %vm253_vm1, %v252_v26 }
  0xe4   : > { %v428_v35 = vpop.f32.mrb[0].mxu0 }
  0xe5   : > { %v1864_v36 = vadd.f32 %v1861_v34, %v428_v35  ;;  %v1356_v37 = vpop.f32.mrb[1].mxu0 }
  0xe7   : > { %v552_v38 = vmin.f32 %v1864_v36, 30.0 }
  0xe8   : > { %v433_v39 = vpop.f32.mrb[2].mxu0 }
  0xe9   : > { %v577_v40 = vmul.f32 1.442695, %v552_v38  ;;  %v1868_v41 = vadd.f32 %v1861_v34, %v433_v39  ;;  %v1359_v42 = vpop.f32.mrb[3].mxu0 }
  0xeb   : > { %1530 = vpow2.f32 %v577_v40  ;;  %v553_v43 = vmin.f32 %v1868_v41, 30.0 }
  0xec   : > { %v438_v44 = vpop.f32.mrb[4].mxu0 }
  0xed   : > { %v579_v45 = vmul.f32 1.442695, %v553_v43  ;;  %v1872_v46 = vadd.f32 %v1861_v34, %v438_v44  ;;  %v1362_v47 = vpop.f32.mrb[5].mxu0 }
  0xef   : > { %1532 = vpow2.f32 %v579_v45  ;;  %v554_v48 = vmin.f32 %v1872_v46, 30.0 }
  0xf0   : > { %v443_v49 = vpop.f32.mrb[6].mxu0 }
  0xf1   : > { %v581_v50 = vmul.f32 1.442695, %v554_v48  ;;  %v1876_v51 = vadd.f32 %v1861_v34, %v443_v49  ;;  %v1365_v52 = vpop.f32.mrb[7].mxu0 }
  0xf3   : > { %1534 = vpow2.f32 %v581_v50  ;;  %v555_v53 = vmin.f32 %v1876_v51, 30.0 }
  0xf4   : > { %v448_v54 = vpop.f32.mrb[8].mxu0 }
  0xf5   : > { %v1531_v55 = vpop.eup %1530  ;;  %v583_v56 = vmul.f32 1.442695, %v555_v53  ;;  %v1880_v57 = vadd.f32 %v1861_v34, %v448_v54  ;;  %v1368_v58 = vpop.f32.mrb[9].mxu0 }
  0xf6   : > { %v627_v59 = vadd.f32 2.0, %v1531_v55 }
  0xf7   : > { %1536 = vpow2.f32 %v583_v56  ;;  %v556_v60 = vmin.f32 %v1880_v57, 30.0 }
  0xf8   : > { %v652_v61 = vmul.f32 %v1531_v55, %v627_v59  ;;  %v453_v62 = vpop.f32.mrb[10].mxu0 }
  0xf9   : > { %v1533_v63 = vpop.eup %1532  ;;  %v585_v0 = vmul.f32 1.442695, %v556_v60  ;;  %v1884_v2 = vadd.f32 %v1861_v34, %v453_v62  ;;  %v1371_v3 = vpop.f32.mrb[11].mxu0 }
  0xfa   : > { %v702_v4 = vadd.f32 2.0, %v652_v61  ;;  %v628_v5 = vadd.f32 2.0, %v1533_v63  ;;  %v677_v28 = vmul.f32 %v652_v61, %v1864_v36 }
  0xfb   : > { %1538 = vpow2.f32 %v585_v0  ;;  %v557_v6 = vmin.f32 %v1884_v2, 30.0 }
  0xfc   : > { %1540 = vrcp.f32 %v702_v4  ;;  %v653_v7 = vmul.f32 %v1533_v63, %v628_v5  ;;  %v458_v8 = vpop.f32.mrb[12].mxu0 }
  0xfd   : > { %v1535_v9 = vpop.eup %1534  ;;  %v587_v10 = vmul.f32 1.442695, %v557_v6  ;;  %v1888_v11 = vadd.f32 %v1861_v34, %v458_v8  ;;  %v1374_v12 = vpop.f32.mrb[13].mxu0 }
  0xfe   : > { %v703_v13 = vadd.f32 2.0, %v653_v7  ;;  %v629_v14 = vadd.f32 2.0, %v1535_v9  ;;  %v678_v43 = vmul.f32 %v653_v7, %v1868_v41 }
  0xff   : > { %1542 = vpow2.f32 %v587_v10  ;;  %v558_v15 = vmin.f32 %v1888_v11, 30.0 }
 0x100   : > { %1544 = vrcp.f32 %v703_v13  ;;  %v654_v16 = vmul.f32 %v1535_v9, %v629_v14  ;;  %v463_v17 = vpop.f32.mrb[14].mxu0 }
 0x101   : > { %v1537_v18 = vpop.eup %1536  ;;  %v589_v19 = vmul.f32 1.442695, %v558_v15  ;;  %v1892_v20 = vadd.f32 %v1861_v34, %v463_v17  ;;  %v1377_v21 = vpop.f32.mrb[15].mxu0 }
 0x102   : > { %v704_v22 = vadd.f32 2.0, %v654_v16  ;;  %v630_v23 = vadd.f32 2.0, %v1537_v18  ;;  %v679_v55 = vmul.f32 %v654_v16, %v1872_v46 }
 0x103   : > { %1546 = vpow2.f32 %v589_v19  ;;  %v559_v24 = vmin.f32 %v1892_v20, 30.0 }
 0x104   : > { %1548 = vrcp.f32 %v704_v22  ;;  %v655_v25 = vmul.f32 %v1537_v18, %v630_v23  ;;  %v468_v26 = vpop.f32.mrb[16].mxu0 }
 0x105   : > { %v1539_v27 = vpop.eup %1538  ;;  %v591_v29 = vmul.f32 1.442695, %v559_v24  ;;  %v1897_v30 = vadd.f32 %v1861_v34, %v468_v26  ;;  %v1380_v31 = vpop.f32.mrb[17].mxu0 }
 0x106   : > { %v1541_v32 = vpop.eup %1540  ;;  %v705_v33 = vadd.f32 2.0, %v655_v25  ;;  %v631_v35 = vadd.f32 2.0, %v1539_v27  ;;  %v680_v5 = vmul.f32 %v655_v25, %v1876_v51 }
 0x107   : > { %v728_v37 = vmul.f32 %v1541_v32, %v677_v28  ;;  %1550 = vpow2.f32 %v591_v29  ;;  %v560_v38 = vmin.f32 %v1897_v30, 30.0 }
 0x108   : > { %1552 = vrcp.f32 %v705_v33  ;;  %v656_v39 = vmul.f32 %v1539_v27, %v631_v35  ;;  %v473_v40 = vpop.f32.mrb[18].mxu0 }
 0x109   : > { %v1543_v42 = vpop.eup %1542  ;;  %v593_v36 = vmul.f32 1.442695, %v560_v38  ;;  %v1902_v44 = vadd.f32 %v1861_v34, %v473_v40  ;;  %v1383_v45 = vpop.f32.mrb[19].mxu0  ;;  %1438 = vmatmul.mubr.msk.f32.vlgmr.msra.gmra.mrb[0].mxu1 %vm788_vm2, %v728_v37 }
 0x10a   : > { %v1545_v47 = vpop.eup %1544  ;;  %v706_v48 = vadd.f32 2.0, %v656_v39  ;;  %v632_v49 = vadd.f32 2.0, %v1543_v42  ;;  %1440 = vmatprep.mubr.msk.f32.mxu1 %vm1639_vm0, %v1638_v1  ;;  %v681_v17 = vmul.f32 %v656_v39, %v1880_v57 }
 0x10b   : > { %v730_v50 = vmul.f32 %v1545_v47, %v678_v43  ;;  %1554 = vpow2.f32 %v593_v36  ;;  %v561_v52 = vmin.f32 %v1902_v44, 30.0 }
 0x10c   : > { %1556 = vrcp.f32 %v706_v48  ;;  %v657_v53 = vmul.f32 %v1543_v42, %v632_v49  ;;  %v478_v41 = vpop.f32.mrb[20].mxu0 }
 0x10d   : > { %v1547_v54 = vpop.eup %1546  ;;  %v595_v56 = vmul.f32 1.442695, %v561_v52  ;;  %v1910_v58 = vadd.f32 %v1861_v34, %v478_v41  ;;  %v1386_v59 = vpop.f32.mrb[21].mxu0  ;;  %1441 = vmatmul.mubr.msk.f32.gmra.mrb[2].mxu1 %vm788_vm2, %v730_v50 }
 0x10e   : > { %v1549_v60 = vpop.eup %1548  ;;  %v707_v61 = vadd.f32 2.0, %v657_v53  ;;  %v633_v62 = vadd.f32 2.0, %v1547_v54  ;;  %1443 = vmatprep.mubr.msk.f32.mxu1 %vm1639_vm0, %v1638_v1  ;;  %v682_v29 = vmul.f32 %v657_v53, %v1884_v2 }
 0x10f   : > { %v732_v63 = vmul.f32 %v1549_v60, %v679_v55  ;;  %1558 = vpow2.f32 %v595_v56  ;;  %v562_v0 = vmin.f32 %v1910_v58, 30.0 }
 0x110   : > { %1560 = vrcp.f32 %v707_v61  ;;  %v658_v3 = vmul.f32 %v1547_v54, %v633_v62  ;;  %v483_v46 = vpop.f32.mrb[22].mxu0 }
 0x111   : > { %v1551_v4 = vpop.eup %1550  ;;  %v597_v6 = vmul.f32 1.442695, %v562_v0  ;;  %v1918_v7 = vadd.f32 %v1861_v34, %v483_v46  ;;  %v1389_v8 = vpop.f32.mrb[23].mxu0  ;;  %1444 = vmatmul.mubr.msk.f32.gmra.mrb[4].mxu1 %vm788_vm2, %v732_v63 }
 0x112   : > { %v1553_v9 = vpop.eup %1552  ;;  %v708_v10 = vadd.f32 2.0, %v658_v3  ;;  %v634_v12 = vadd.f32 2.0, %v1551_v4  ;;  %1446 = vmatprep.mubr.msk.f32.mxu1 %vm1639_vm0, %v1638_v1  ;;  %v683_v36 = vmul.f32 %v658_v3, %v1888_v11 }
 0x113   : > { %v734_v13 = vmul.f32 %v1553_v9, %v680_v5  ;;  %1562 = vpow2.f32 %v597_v6  ;;  %v563_v14 = vmin.f32 %v1918_v7, 30.0 }
 0x114   : > { %1564 = vrcp.f32 %v708_v10  ;;  %v659_v15 = vmul.f32 %v1551_v4, %v634_v12  ;;  %v488_v51 = vpop.f32.mrb[24].mxu0 }
 0x115   : > { %v1555_v16 = vpop.eup %1554  ;;  %v599_v18 = vmul.f32 1.442695, %v563_v14  ;;  %v1926_v19 = vadd.f32 %v1861_v34, %v488_v51  ;;  %v1392_v21 = vpop.f32.mrb[25].mxu0  ;;  %1447 = vmatmul.mubr.msk.f32.gmra.mrb[6].mxu1 %vm788_vm2, %v734_v13 }
 0x116   : > { %v1557_v22 = vpop.eup %1556  ;;  %v709_v23 = vadd.f32 2.0, %v659_v15  ;;  %v635_v24 = vadd.f32 2.0, %v1555_v16  ;;  %1449 = vmatprep.mubr.msk.f32.mxu1 %vm1639_vm0, %v1638_v1  ;;  %v684_v56 = vmul.f32 %v659_v15, %v1892_v20 }
 0x117   : > { %v736_v25 = vmul.f32 %v1557_v22, %v681_v17  ;;  %1566 = vpow2.f32 %v599_v18  ;;  %v564_v26 = vmin.f32 %v1926_v19, 30.0 }
 0x118   : > { %1568 = vrcp.f32 %v709_v23  ;;  %v660_v27 = vmul.f32 %v1555_v16, %v635_v24  ;;  %v493_v57 = vpop.f32.mrb[26].mxu0 }
 0x119   : > { %v1559_v28 = vpop.eup %1558  ;;  %v601_v31 = vmul.f32 1.442695, %v564_v26  ;;  %v1934_v32 = vadd.f32 %v1861_v34, %v493_v57  ;;  %v1395_v33 = vpop.f32.mrb[27].mxu0  ;;  %1450 = vmatmul.mubr.msk.f32.gmra.mrb[8].mxu1 %vm788_vm2, %v736_v25 }
 0x11a   : > { %v1561_v35 = vpop.eup %1560  ;;  %v710_v37 = vadd.f32 2.0, %v660_v27  ;;  %v636_v38 = vadd.f32 2.0, %v1559_v28  ;;  %1452 = vmatprep.mubr.msk.f32.mxu1 %vm1639_vm0, %v1638_v1  ;;  %v685_v6 = vmul.f32 %v660_v27, %v1897_v30 }
 0x11b   : > { %v738_v39 = vmul.f32 %v1561_v35, %v682_v29  ;;  %1570 = vpow2.f32 %v601_v31  ;;  %v565_v40 = vmin.f32 %v1934_v32, 30.0 }
 0x11c   : > { %1572 = vrcp.f32 %v710_v37  ;;  %v661_v42 = vmul.f32 %v1559_v28, %v636_v38  ;;  %v498_v2 = vpop.f32.mrb[28].mxu0 }
 0x11d   : > { %v1563_v43 = vpop.eup %1562  ;;  %v603_v45 = vmul.f32 1.442695, %v565_v40  ;;  %v1942_v47 = vadd.f32 %v1861_v34, %v498_v2  ;;  %v1398_v48 = vpop.f32.mrb[29].mxu0  ;;  %1453 = vmatmul.mubr.msk.f32.gmra.mrb[10].mxu1 %vm788_vm2, %v738_v39 }
 0x11e   : > { %v1565_v49 = vpop.eup %1564  ;;  %v711_v50 = vadd.f32 2.0, %v661_v42  ;;  %v637_v52 = vadd.f32 2.0, %v1563_v43  ;;  %1455 = vmatprep.mubr.msk.f32.mxu1 %vm1639_vm0, %v1638_v1  ;;  %v686_v18 = vmul.f32 %v661_v42, %v1902_v44 }
 0x11f   : > { %v740_v53 = vmul.f32 %v1565_v49, %v683_v36  ;;  %1574 = vpow2.f32 %v603_v45  ;;  %v566_v41 = vmin.f32 %v1942_v47, 30.0 }
 0x120   : > { %1576 = vrcp.f32 %v711_v50  ;;  %v662_v54 = vmul.f32 %v1563_v43, %v637_v52  ;;  %v503_v11 = vpop.f32.mrb[30].mxu0 }
 0x121   : > { %v1567_v55 = vpop.eup %1566  ;;  %v605_v59 = vmul.f32 1.442695, %v566_v41  ;;  %v1950_v60 = vadd.f32 %v1861_v34, %v503_v11  ;;  %v1401_v61 = vpop.f32.mrb[31].mxu0  ;;  %1456 = vmatmul.mubr.msk.f32.gmra.mrb[12].mxu1 %vm788_vm2, %v740_v53 }
 0x122   : > { %v1569_v62 = vpop.eup %1568  ;;  %v712_v63 = vadd.f32 2.0, %v662_v54  ;;  %v638_v0 = vadd.f32 2.0, %v1567_v55  ;;  %1458 = vmatprep.mubr.msk.f32.mxu1 %vm1639_vm0, %v1638_v1  ;;  %v687_v31 = vmul.f32 %v662_v54, %v1910_v58 }
 0x123   : > { %v742_v3 = vmul.f32 %v1569_v62, %v684_v56  ;;  %1578 = vpow2.f32 %v605_v59  ;;  %v567_v46 = vmin.f32 %v1950_v60, 30.0 }
 0x124   : > { %1580 = vrcp.f32 %v712_v63  ;;  %v663_v4 = vmul.f32 %v1567_v55, %v638_v0  ;;  %v508_v20 = vpop.f32.mrb[32].mxu0 }
 0x125   : > { %v1571_v5 = vpop.eup %1570  ;;  %v607_v8 = vmul.f32 1.442695, %v567_v46  ;;  %v1958_v9 = vadd.f32 %v1861_v34, %v508_v20  ;;  %v1404_v10 = vpop.f32.mrb[33].mxu0  ;;  %1459 = vmatmul.mubr.msk.f32.gmra.mrb[14].mxu1 %vm788_vm2, %v742_v3 }
 0x126   : > { %v1573_v12 = vpop.eup %1572  ;;  %v713_v13 = vadd.f32 2.0, %v663_v4  ;;  %v639_v14 = vadd.f32 2.0, %v1571_v5  ;;  %1461 = vmatprep.mubr.msk.f32.mxu1 %vm1639_vm0, %v1638_v1  ;;  %v688_v45 = vmul.f32 %v663_v4, %v1918_v7 }
 0x127   : > { %v744_v15 = vmul.f32 %v1573_v12, %v685_v6  ;;  %1582 = vpow2.f32 %v607_v8  ;;  %v568_v51 = vmin.f32 %v1958_v9, 30.0 }
 0x128   : > { %1584 = vrcp.f32 %v713_v13  ;;  %v664_v16 = vmul.f32 %v1571_v5, %v639_v14  ;;  %v513_v30 = vpop.f32.mrb[34].mxu0 }
 0x129   : > { %v1575_v17 = vpop.eup %1574  ;;  %v609_v21 = vmul.f32 1.442695, %v568_v51  ;;  %v1966_v22 = vadd.f32 %v1861_v34, %v513_v30  ;;  %v1407_v23 = vpop.f32.mrb[35].mxu0  ;;  %1462 = vmatmul.mubr.msk.f32.gmra.mrb[16].mxu1 %vm788_vm2, %v744_v15 }
 0x12a   : > { %v1577_v24 = vpop.eup %1576  ;;  %v714_v25 = vadd.f32 2.0, %v664_v16  ;;  %v640_v26 = vadd.f32 2.0, %v1575_v17  ;;  %1464 = vmatprep.mubr.msk.f32.mxu1 %vm1639_vm0, %v1638_v1  ;;  %v689_v59 = vmul.f32 %v664_v16, %v1926_v19 }
 0x12b   : > { %v746_v27 = vmul.f32 %v1577_v24, %v686_v18  ;;  %1586 = vpow2.f32 %v609_v21  ;;  %v569_v57 = vmin.f32 %v1966_v22, 30.0 }
 0x12c   : > { %1588 = vrcp.f32 %v714_v25  ;;  %v665_v28 = vmul.f32 %v1575_v17, %v640_v26  ;;  %v518_v44 = vpop.f32.mrb[36].mxu0 }
 0x12d   : > { %v1579_v29 = vpop.eup %1578  ;;  %v611_v33 = vmul.f32 1.442695, %v569_v57  ;;  %v1974_v35 = vadd.f32 %v1861_v34, %v518_v44  ;;  %v1410_v37 = vpop.f32.mrb[37].mxu0  ;;  %1465 = vmatmul.mubr.msk.f32.gmra.mrb[18].mxu1 %vm788_vm2, %v746_v27 }
 0x12e   : > { %v1581_v38 = vpop.eup %1580  ;;  %v715_v39 = vadd.f32 2.0, %v665_v28  ;;  %v641_v40 = vadd.f32 2.0, %v1579_v29  ;;  %1467 = vmatprep.mubr.msk.f32.mxu1 %vm1639_vm0, %v1638_v1  ;;  %v690_v8 = vmul.f32 %v665_v28, %v1934_v32 }
 0x12f   : > { %v748_v42 = vmul.f32 %v1581_v38, %v687_v31  ;;  %1590 = vpow2.f32 %v611_v33  ;;  %v570_v2 = vmin.f32 %v1974_v35, 30.0 }
 0x130   : > { %1592 = vrcp.f32 %v715_v39  ;;  %v666_v43 = vmul.f32 %v1579_v29, %v641_v40  ;;  %v523_v58 = vpop.f32.mrb[38].mxu0 }
 0x131   : > { %v1583_v36 = vpop.eup %1582  ;;  %v613_v48 = vmul.f32 1.442695, %v570_v2  ;;  %v1982_v49 = vadd.f32 %v1861_v34, %v523_v58  ;;  %v1413_v50 = vpop.f32.mrb[39].mxu0  ;;  %1468 = vmatmul.mubr.msk.f32.gmra.mrb[20].mxu1 %vm788_vm2, %v748_v42 }
 0x132   : > { %v1585_v52 = vpop.eup %1584  ;;  %v716_v53 = vadd.f32 2.0, %v666_v43  ;;  %v642_v41 = vadd.f32 2.0, %v1583_v36  ;;  %1470 = vmatprep.mubr.msk.f32.mxu1 %vm1639_vm0, %v1638_v1  ;;  %v691_v21 = vmul.f32 %v666_v43, %v1942_v47 }
 0x133   : > { %v750_v54 = vmul.f32 %v1585_v52, %v688_v45  ;;  %1594 = vpow2.f32 %v613_v48  ;;  %v571_v11 = vmin.f32 %v1982_v49, 30.0 }
 0x134   : > { %1596 = vrcp.f32 %v716_v53  ;;  %v667_v55 = vmul.f32 %v1583_v36, %v642_v41  ;;  %v528_v7 = vpop.f32.mrb[40].mxu0 }
 0x135   : > { %v1587_v56 = vpop.eup %1586  ;;  %v615_v61 = vmul.f32 1.442695, %v571_v11  ;;  %v1990_v62 = vadd.f32 %v1861_v34, %v528_v7  ;;  %v1416_v63 = vpop.f32.mrb[41].mxu0  ;;  %1471 = vmatmul.mubr.msk.f32.gmra.mrb[22].mxu1 %vm788_vm2, %v750_v54 }
 0x136   : > { %v1589_v0 = vpop.eup %1588  ;;  %v717_v3 = vadd.f32 2.0, %v667_v55  ;;  %v643_v46 = vadd.f32 2.0, %v1587_v56  ;;  %1473 = vmatprep.mubr.msk.f32.mxu1 %vm1639_vm0, %v1638_v1  ;;  %v692_v33 = vmul.f32 %v667_v55, %v1950_v60 }
 0x137   : > { %v752_v4 = vmul.f32 %v1589_v0, %v689_v59  ;;  %1598 = vpow2.f32 %v615_v61  ;;  %v572_v20 = vmin.f32 %v1990_v62, 30.0 }
 0x138   : > { %1600 = vrcp.f32 %v717_v3  ;;  %v668_v5 = vmul.f32 %v1587_v56, %v643_v46  ;;  %v533_v19 = vpop.f32.mrb[42].mxu0 }
 0x139   : > { %v1591_v6 = vpop.eup %1590  ;;  %v617_v10 = vmul.f32 1.442695, %v572_v20  ;;  %v1998_v12 = vadd.f32 %v1861_v34, %v533_v19  ;;  %v1419_v13 = vpop.f32.mrb[43].mxu0  ;;  %1474 = vmatmul.mubr.msk.f32.gmra.mrb[24].mxu1 %vm788_vm2, %v752_v4 }
 0x13a   : > { %v1593_v14 = vpop.eup %1592  ;;  %v718_v15 = vadd.f32 2.0, %v668_v5  ;;  %v644_v51 = vadd.f32 2.0, %v1591_v6  ;;  %1476 = vmatprep.mubr.msk.f32.mxu1 %vm1639_vm0, %v1638_v1  ;;  %v693_v48 = vmul.f32 %v668_v5, %v1958_v9 }
 0x13b   : > { %v754_v16 = vmul.f32 %v1593_v14, %v690_v8  ;;  %1602 = vpow2.f32 %v617_v10  ;;  %v573_v30 = vmin.f32 %v1998_v12, 30.0 }
 0x13c   : > { %1604 = vrcp.f32 %v718_v15  ;;  %v669_v17 = vmul.f32 %v1591_v6, %v644_v51  ;;  %v538_v32 = vpop.f32.mrb[44].mxu0 }
 0x13d   : > { %v1595_v18 = vpop.eup %1594  ;;  %v619_v23 = vmul.f32 1.442695, %v573_v30  ;;  %v2006_v24 = vadd.f32 %v1861_v34, %v538_v32  ;;  %v1422_v25 = vpop.f32.mrb[45].mxu0  ;;  %1477 = vmatmul.mubr.msk.f32.gmra.mrb[26].mxu1 %vm788_vm2, %v754_v16 }
 0x13e   : > { %v1597_v26 = vpop.eup %1596  ;;  %v719_v27 = vadd.f32 2.0, %v669_v17  ;;  %v645_v57 = vadd.f32 2.0, %v1595_v18  ;;  %1479 = vmatprep.mubr.msk.f32.mxu1 %vm1639_vm0, %v1638_v1  ;;  %v694_v59 = vmul.f32 %v669_v17, %v1966_v22 }
 0x13f   : > { %v756_v28 = vmul.f32 %v1597_v26, %v691_v21  ;;  %1606 = vpow2.f32 %v619_v23  ;;  %v574_v44 = vmin.f32 %v2006_v24, 30.0 }
 0x140   : > { %1608 = vrcp.f32 %v719_v27  ;;  %v670_v29 = vmul.f32 %v1595_v18, %v645_v57  ;;  %v543_v47 = vpop.f32.mrb[46].mxu0 }
 0x141   : > { %v1599_v31 = vpop.eup %1598  ;;  %v621_v37 = vmul.f32 1.442695, %v574_v44  ;;  %v2014_v38 = vadd.f32 %v1861_v34, %v543_v47  ;;  %v1425_v39 = vpop.f32.mrb[47].mxu0  ;;  %1480 = vmatmul.mubr.msk.f32.gmra.mrb[28].mxu1 %vm788_vm2, %v756_v28 }
 0x142   : > { %v1601_v40 = vpop.eup %1600  ;;  %v720_v42 = vadd.f32 2.0, %v670_v29  ;;  %v646_v2 = vadd.f32 2.0, %v1599_v31  ;;  %1482 = vmatprep.mubr.msk.f32.mxu1 %vm1639_vm0, %v1638_v1  ;;  %v695_v20 = vmul.f32 %v670_v29, %v1974_v35 }
 0x143   : > { %v758_v43 = vmul.f32 %v1601_v40, %v692_v33  ;;  %1610 = vpow2.f32 %v621_v37  ;;  %v575_v58 = vmin.f32 %v2014_v38, 30.0  ;;  %v2064_v37 = vld [vmem:[%s2173_s4] ss:$0 sm:$0xff] }
 0x144   : > { %1612 = vrcp.f32 %v720_v42  ;;  %v671_v36 = vmul.f32 %v1599_v31, %v646_v2  ;;  %v548_v60 = vpop.f32.mrb[48].mxu0 }
 0x145   : > { %v1603_v45 = vpop.eup %1602  ;;  %v623_v50 = vmul.f32 1.442695, %v575_v58  ;;  %v2022_v52 = vadd.f32 %v1861_v34, %v548_v60  ;;  %v1428_v53 = vpop.f32.mrb[49].mxu0  ;;  %1483 = vmatmul.mubr.msk.f32.gmra.mrb[30].mxu1 %vm788_vm2, %v758_v43 }
 0x146   : > { %v1605_v41 = vpop.eup %1604  ;;  %v721_v54 = vadd.f32 2.0, %v671_v36  ;;  %v647_v11 = vadd.f32 2.0, %v1603_v45  ;;  %1485 = vmatprep.mubr.msk.f32.mxu1 %vm1639_vm0, %v1638_v1  ;;  %v696_v13 = vmul.f32 %v671_v36, %v1982_v49 }
 0x147   : > { %v760_v55 = vmul.f32 %v1605_v41, %v693_v48  ;;  %1614 = vpow2.f32 %v623_v50  ;;  %v576_v7 = vmin.f32 %v2022_v52, 30.0 }
 0x148   : > { %1616 = vrcp.f32 %v721_v54  ;;  %v672_v56 = vmul.f32 %v1603_v45, %v647_v11 }
 0x149   : > { %v1607_v9 = vpop.eup %1606  ;;  %v625_v34 = vmul.f32 1.442695, %v576_v7  ;;  %1486 = vmatmul.mubr.msk.f32.gmra.mrb[32].mxu1 %vm788_vm2, %v760_v55 }
 0x14a   : > { %v1609_v61 = vpop.eup %1608  ;;  %v722_v63 = vadd.f32 2.0, %v672_v56  ;;  %v648_v0 = vadd.f32 2.0, %v1607_v9  ;;  %1488 = vmatprep.mubr.msk.f32.mxu1 %vm1639_vm0, %v1638_v1  ;;  %v697_v17 = vmul.f32 %v672_v56, %v1990_v62 }
 0x14b   : > { %v762_v3 = vmul.f32 %v1609_v61, %v694_v59  ;;  %1618 = vpow2.f32 %v625_v34 }
 0x14c   : > { %1620 = vrcp.f32 %v722_v63  ;;  %v673_v46 = vmul.f32 %v1607_v9, %v648_v0 }
 0x14d   : > { %v1611_v4 = vpop.eup %1610  ;;  %1489 = vmatmul.mubr.msk.f32.gmra.mrb[34].mxu1 %vm788_vm2, %v762_v3 }
 0x14e   : > { %v1613_v5 = vpop.eup %1612  ;;  %v723_v22 = vadd.f32 2.0, %v673_v46  ;;  %v649_v19 = vadd.f32 2.0, %v1611_v4  ;;  %1491 = vmatprep.mubr.msk.f32.mxu1 %vm1639_vm0, %v1638_v1  ;;  %v698_v25 = vmul.f32 %v673_v46, %v1998_v12 }
 0x14f   : > { %v764_v6 = vmul.f32 %v1613_v5, %v695_v20 }
 0x150   : > { %1622 = vrcp.f32 %v723_v22  ;;  %v674_v8 = vmul.f32 %v1611_v4, %v649_v19 }
 0x151   : > { %v1615_v10 = vpop.eup %1614  ;;  %1492 = vmatmul.mubr.msk.f32.gmra.mrb[36].mxu1 %vm788_vm2, %v764_v6 }
 0x152   : > { %v1617_v14 = vpop.eup %1616  ;;  %v724_v15 = vadd.f32 2.0, %v674_v8  ;;  %v650_v51 = vadd.f32 2.0, %v1615_v10  ;;  %1494 = vmatprep.mubr.msk.f32.mxu1 %vm1639_vm0, %v1638_v1  ;;  %v699_v57 = vmul.f32 %v674_v8, %v2006_v24 }
 0x153   : > { %v766_v35 = vmul.f32 %v1617_v14, %v696_v13 }
 0x154   : > { %1624 = vrcp.f32 %v724_v15  ;;  %v675_v16 = vmul.f32 %v1615_v10, %v650_v51 }
 0x155   : > { %v1619_v30 = vpop.eup %1618  ;;  %1495 = vmatmul.mubr.msk.f32.gmra.mrb[38].mxu1 %vm788_vm2, %v766_v35 }
 0x156   : > { %v1621_v32 = vpop.eup %1620  ;;  %v725_v18 = vadd.f32 2.0, %v675_v16  ;;  %v651_v21 = vadd.f32 2.0, %v1619_v30  ;;  %1497 = vmatprep.mubr.msk.f32.mxu1 %vm1639_vm0, %v1638_v1  ;;  %v700_v12 = vmul.f32 %v675_v16, %v2014_v38 }
 0x157   : > { %v768_v49 = vmul.f32 %v1621_v32, %v697_v17 }
 0x158   : > { %1626 = vrcp.f32 %v725_v18  ;;  %v676_v23 = vmul.f32 %v1619_v30, %v651_v21 }
 0x159   : > { %1498 = vmatmul.mubr.msk.f32.gmra.mrb[40].mxu1 %vm788_vm2, %v768_v49 }
 0x15a   : > { %v1623_v26 = vpop.eup %1622  ;;  %v726_v27 = vadd.f32 2.0, %v676_v23  ;;  %1500 = vmatprep.mubr.msk.f32.mxu1 %vm1639_vm0, %v1638_v1  ;;  %v701_v31 = vmul.f32 %v676_v23, %v2022_v52 }
 0x15b   : > { %v770_v62 = vmul.f32 %v1623_v26, %v698_v25 }
 0x15c   : > { %1628 = vrcp.f32 %v726_v27 }
 0x15d   : > { %1501 = vmatmul.mubr.msk.f32.gmra.mrb[42].mxu1 %vm788_vm2, %v770_v62 }
 0x15e   : > { %v1625_v28 = vpop.eup %1624  ;;  %1503 = vmatprep.mubr.msk.f32.mxu1 %vm1639_vm0, %v1638_v1 }
 0x15f   : > { %v772_v44 = vmul.f32 %v1625_v28, %v699_v57 }
 0x161   : > { %1504 = vmatmul.mubr.msk.f32.gmra.mrb[44].mxu1 %vm788_vm2, %v772_v44 }
 0x162   : > { %v1627_v29 = vpop.eup %1626  ;;  %1506 = vmatprep.mubr.msk.f32.mxu1 %vm1639_vm0, %v1638_v1 }
 0x163   : > { %v774_v47 = vmul.f32 %v1627_v29, %v700_v12 }
 0x165   : > { %1507 = vmatmul.mubr.msk.f32.gmra.mrb[46].mxu1 %vm788_vm2, %v774_v47 }
 0x166   : > { %v1629_v24 = vpop.eup %1628  ;;  %1509 = vmatprep.mubr.msk.f32.mxu1 %vm1639_vm0, %v1638_v1 }
 0x167   : > { %v776_v33 = vmul.f32 %v1629_v24, %v701_v31 }
 0x169   : > { %1510 = vmatmul.mubr.msk.f32.gmra.mrb[48].mxu1 %vm788_vm2, %v776_v33 }
 0x1dc   : > { %v930_v38 = vpop.f32.mrb[0].mxu1 }
 0x1dd   : > { %v931_v39 = vadd.f32 %v2064_v37, %v930_v38  ;;  %v1439_v40 = vpop.f32.mrb[1].mxu1 }
 0x1df   : > { %1079 = vrot.lane.b32.xlu0 %v931_v39, %s1641_s17 }
 0x1e0   : > { %v935_v42 = vpop.f32.mrb[2].mxu1 }
 0x1e1   : > { %v936_v2 = vadd.f32 %v2064_v37, %v935_v42  ;;  %v1442_v43 = vpop.f32.mrb[3].mxu1 }
 0x1e3   : > { %1081 = vrot.lane.b32.xlu0 %v936_v2, %s1641_s17 }
 0x1e4   : > { %v940_v1 = vpop.f32.mrb[4].mxu1 }
 0x1e5   : > { %v941_v58 = vadd.f32 %v2064_v37, %v940_v1  ;;  %v1445_v36 = vpop.f32.mrb[5].mxu1 }
 0x1e7   : > { %1083 = vrot.lane.b32.xlu1 %v941_v58, %s1641_s17 }
 0x1e8   : > { %v945_v60 = vpop.f32.mrb[6].mxu1 }
 0x1e9   : > { %v946_v45 = vadd.f32 %v2064_v37, %v945_v60  ;;  %v1448_v48 = vpop.f32.mrb[7].mxu1 }
 0x1eb   : > { %1085 = vrot.lane.b32.xlu1 %v946_v45, %s1641_s17 }
 0x1ec   : > { %v950_v50 = vpop.f32.mrb[8].mxu1 }
 0x1ed   : > { %v951_v52 = vadd.f32 %v2064_v37, %v950_v50  ;;  %v1451_v53 = vpop.f32.mrb[9].mxu1 }
 0x1ef   : > { %1087 = vrot.lane.b32.xlu0 %v951_v52, %s1641_s17 }
 0x1f0   : > { %v955_v41 = vpop.f32.mrb[10].mxu1 }
 0x1f1   : > { %v956_v54 = vadd.f32 %v2064_v37, %v955_v41  ;;  %v1454_v11 = vpop.f32.mrb[11].mxu1 }
 0x1f3   : > { %1089 = vrot.lane.b32.xlu1 %v956_v54, %s1641_s17 }
 0x1f4   : > { %v960_v55 = vpop.f32.mrb[12].mxu1 }
 0x1f5   : > { %v961_v7 = vadd.f32 %v2064_v37, %v960_v55  ;;  %v1457_v56 = vpop.f32.mrb[13].mxu1 }
 0x1f7   : > { %1091 = vrot.lane.b32.xlu0 %v961_v7, %s1641_s17 }
 0x1f8   : > { %v965_v9 = vpop.f32.mrb[14].mxu1 }
 0x1f9   : > { %v966_v59 = vadd.f32 %v2064_v37, %v965_v9  ;;  %v1460_v34 = vpop.f32.mrb[15].mxu1 }
 0x1fb   : > { %1093 = vrot.lane.b32.xlu1 %v966_v59, %s1641_s17 }
 0x1fc   : > { %v970_v61 = vpop.f32.mrb[16].mxu1 }
 0x1fd   : > { %v971_v63 = vadd.f32 %v2064_v37, %v970_v61  ;;  %v1463_v0 = vpop.f32.mrb[17].mxu1 }
 0x1ff   : > { %1095 = vrot.lane.b32.xlu0 %v971_v63, %s1641_s17 }
 0x200   : > { %v975_v3 = vpop.f32.mrb[18].mxu1 }
 0x201   : > { %v976_v46 = vadd.f32 %v2064_v37, %v975_v3  ;;  %v1466_v4 = vpop.f32.mrb[19].mxu1 }
 0x203   : > { %1097 = vrot.lane.b32.xlu1 %v976_v46, %s1641_s17 }
 0x204   : > { %v980_v20 = vpop.f32.mrb[20].mxu1 }
 0x205   : > { %v981_v5 = vadd.f32 %v2064_v37, %v980_v20  ;;  %v1469_v22 = vpop.f32.mrb[21].mxu1 }
 0x207   : > { %1099 = vrot.lane.b32.xlu0 %v981_v5, %s1641_s17 }
 0x208   : > { %v985_v19 = vpop.f32.mrb[22].mxu1 }
 0x209   : > { %v986_v6 = vadd.f32 %v2064_v37, %v985_v19  ;;  %v1472_v8 = vpop.f32.mrb[23].mxu1 }
 0x20b   : > { %1101 = vrot.lane.b32.xlu1 %v986_v6, %s1641_s17 }
 0x20c   : > { %v990_v10 = vpop.f32.mrb[24].mxu1 }
 0x20d   : > { %v991_v13 = vadd.f32 %v2064_v37, %v990_v10  ;;  %v1475_v14 = vpop.f32.mrb[25].mxu1 }
 0x20f   : > { %1103 = vrot.lane.b32.xlu0 %v991_v13, %s1641_s17 }
 0x210   : > { %v995_v15 = vpop.f32.mrb[26].mxu1 }
 0x211   : > { %v996_v51 = vadd.f32 %v2064_v37, %v995_v15  ;;  %v1478_v35 = vpop.f32.mrb[27].mxu1 }
 0x213   : > { %1105 = vrot.lane.b32.xlu1 %v996_v51, %s1641_s17 }
 0x214   : > { %v1000_v16 = vpop.f32.mrb[28].mxu1 }
 0x215   : > { %v1001_v30 = vadd.f32 %v2064_v37, %v1000_v16  ;;  %v1481_v17 = vpop.f32.mrb[29].mxu1 }
 0x217   : > { %1107 = vrot.lane.b32.xlu0 %v1001_v30, %s1641_s17 }
 0x218   : > { %v1005_v32 = vpop.f32.mrb[30].mxu1 }
 0x219   : > { %v1006_v18 = vadd.f32 %v2064_v37, %v1005_v32  ;;  %v1484_v21 = vpop.f32.mrb[31].mxu1 }
 0x21b   : > { %1109 = vrot.lane.b32.xlu1 %v1006_v18, %s1641_s17 }
 0x21c   : > { %v1010_v49 = vpop.f32.mrb[32].mxu1 }
 0x21d   : > { %v1011_v23 = vadd.f32 %v2064_v37, %v1010_v49  ;;  %v1487_v25 = vpop.f32.mrb[33].mxu1 }
 0x21f   : > { %1111 = vrot.lane.b32.xlu0 %v1011_v23, %s1641_s17 }
 0x220   : > { %v1015_v26 = vpop.f32.mrb[34].mxu1 }
 0x221   : > { %v1016_v27 = vadd.f32 %v2064_v37, %v1015_v26  ;;  %v1490_v62 = vpop.f32.mrb[35].mxu1 }
 0x223   : > { %1113 = vrot.lane.b32.xlu1 %v1016_v27, %s1641_s17 }
 0x224   : > { %v1020_v57 = vpop.f32.mrb[36].mxu1 }
 0x225   : > { %v1021_v28 = vadd.f32 %v2064_v37, %v1020_v57  ;;  %v1493_v44 = vpop.f32.mrb[37].mxu1 }
 0x227   : > { %1115 = vrot.lane.b32.xlu0 %v1021_v28, %s1641_s17 }
 0x228   : > { %v1025_v12 = vpop.f32.mrb[38].mxu1 }
 0x229   : > { %v1026_v29 = vadd.f32 %v2064_v37, %v1025_v12  ;;  %v1496_v47 = vpop.f32.mrb[39].mxu1 }
 0x22b   : > { %1117 = vrot.lane.b32.xlu1 %v1026_v29, %s1641_s17 }
 0x22c   : > { %v1030_v31 = vpop.f32.mrb[40].mxu1 }
 0x22d   : > { %v1031_v24 = vadd.f32 %v2064_v37, %v1030_v31  ;;  %v1499_v33 = vpop.f32.mrb[41].mxu1 }
 0x22f   : > { %1119 = vrot.lane.b32.xlu0 %v1031_v24, %s1641_s17 }
 0x230   : > { %v1035_v38 = vpop.f32.mrb[42].mxu1 }
 0x231   : > { %v1036_v39 = vadd.f32 %v2064_v37, %v1035_v38  ;;  %v1502_v40 = vpop.f32.mrb[43].mxu1 }
 0x233   : > { %1121 = vrot.lane.b32.xlu1 %v1036_v39, %s1641_s17 }
 0x234   : > { %v1040_v42 = vpop.f32.mrb[44].mxu1 }
 0x235   : > { %v1041_v2 = vadd.f32 %v2064_v37, %v1040_v42  ;;  %v1505_v43 = vpop.f32.mrb[45].mxu1 }
 0x237   : > { %1123 = vrot.lane.b32.xlu0 %v1041_v2, %s1641_s17 }
 0x238   : > { %v1045_v1 = vpop.f32.mrb[46].mxu1 }
 0x239   : > { %v1046_v58 = vadd.f32 %v2064_v37, %v1045_v1  ;;  %v1508_v36 = vpop.f32.mrb[47].mxu1 }
 0x23b   : > { %1125 = vrot.lane.b32.xlu1 %v1046_v58, %s1641_s17 }
 0x23c   : > { %v1050_v60 = vpop.f32.mrb[48].mxu1 }
 0x23d   : > { %v1051_v45 = vadd.f32 %v2064_v37, %v1050_v60  ;;  %v1511_v48 = vpop.f32.mrb[49].mxu1 }
 0x23f   : > { %1127 = vrot.lane.b32.xlu0 %v1051_v45, %s1641_s17 }
 0x251   : > { %v1080_v50 = vpop.permute.xlu0 %1079 }
 0x252   : > { %1155 = vst.msk [vmem:[%s1696_s29] sm:$0xff] %vm1154_vm3, %v1080_v50 }
 0x255   : > { %v1082_v52 = vpop.permute.xlu0 %1081 }
 0x256   : > { %1156 = vst.msk [vmem:[%s1696_s29 + $0x8] sm:$0xff] %vm1154_vm3, %v1082_v52 }
 0x259   : > { %v1084_v53 = vpop.permute.xlu1 %1083 }
 0x25a   : > { %1157 = vst.msk [vmem:[%s1696_s29 + $0x10] sm:$0xff] %vm1154_vm3, %v1084_v53 }
 0x25d   : > { %v1086_v41 = vpop.permute.xlu1 %1085 }
 0x25e   : > { %1158 = vst.msk [vmem:[%s1696_s29 + $0x18] sm:$0xff] %vm1154_vm3, %v1086_v41 }
 0x261   : > { %v1088_v37 = vpop.permute.xlu0 %1087 }
 0x262   : > { %1159 = vst.msk [vmem:[%s1696_s29 + $0x20] sm:$0xff] %vm1154_vm3, %v1088_v37 }
 0x265   : > { %v1090_v54 = vpop.permute.xlu1 %1089 }
 0x266   : > { %1160 = vst.msk [vmem:[%s1696_s29 + $0x28] sm:$0xff] %vm1154_vm3, %v1090_v54 }
 0x269   : > { %v1092_v11 = vpop.permute.xlu0 %1091 }
 0x26a   : > { %1161 = vst.msk [vmem:[%s1696_s29 + $0x30] sm:$0xff] %vm1154_vm3, %v1092_v11 }
 0x26d   : > { %v1094_v55 = vpop.permute.xlu1 %1093 }
 0x26e   : > { %1162 = vst.msk [vmem:[%s1696_s29 + $0x38] sm:$0xff] %vm1154_vm3, %v1094_v55 }
 0x271   : > { %v1096_v7 = vpop.permute.xlu0 %1095 }
 0x272   : > { %1163 = vst.msk [vmem:[%s1696_s29 + $0x40] sm:$0xff] %vm1154_vm3, %v1096_v7 }
 0x275   : > { %v1098_v56 = vpop.permute.xlu1 %1097 }
 0x276   : > { %1164 = vst.msk [vmem:[%s1696_s29 + $0x48] sm:$0xff] %vm1154_vm3, %v1098_v56 }
 0x279   : > { %v1100_v9 = vpop.permute.xlu0 %1099 }
 0x27a   : > { %1165 = vst.msk [vmem:[%s1696_s29 + $0x50] sm:$0xff] %vm1154_vm3, %v1100_v9 }
 0x27d   : > { %v1102_v59 = vpop.permute.xlu1 %1101 }
 0x27e   : > { %1166 = vst.msk [vmem:[%s1696_s29 + $0x58] sm:$0xff] %vm1154_vm3, %v1102_v59 }
 0x281   : > { %v1104_v34 = vpop.permute.xlu0 %1103 }
 0x282   : > { %1167 = vst.msk [vmem:[%s1696_s29 + $0x60] sm:$0xff] %vm1154_vm3, %v1104_v34 }
 0x285   : > { %v1106_v61 = vpop.permute.xlu1 %1105 }
 0x286   : > { %1168 = vst.msk [vmem:[%s1696_s29 + $0x68] sm:$0xff] %vm1154_vm3, %v1106_v61 }
 0x289   : > { %v1108_v63 = vpop.permute.xlu0 %1107 }
 0x28a   : > { %1169 = vst.msk [vmem:[%s1696_s29 + $0x70] sm:$0xff] %vm1154_vm3, %v1108_v63 }
 0x28d   : > { %v1110_v0 = vpop.permute.xlu1 %1109 }
 0x28e   : > { %1170 = vst.msk [vmem:[%s1696_s29 + $0x78] sm:$0xff] %vm1154_vm3, %v1110_v0 }
 0x291   : > { %v1112_v3 = vpop.permute.xlu0 %1111 }
 0x292   : > { %1171 = vst.msk [vmem:[%s1696_s29 + $0x80] sm:$0xff] %vm1154_vm3, %v1112_v3 }
 0x295   : > { %v1114_v46 = vpop.permute.xlu1 %1113 }
 0x296   : > { %1172 = vst.msk [vmem:[%s1696_s29 + $0x88] sm:$0xff] %vm1154_vm3, %v1114_v46 }
 0x299   : > { %v1116_v4 = vpop.permute.xlu0 %1115 }
 0x29a   : > { %1173 = vst.msk [vmem:[%s1696_s29 + $0x90] sm:$0xff] %vm1154_vm3, %v1116_v4 }
 0x29d   : > { %v1118_v20 = vpop.permute.xlu1 %1117 }
 0x29e   : > { %1174 = vst.msk [vmem:[%s1696_s29 + $0x98] sm:$0xff] %vm1154_vm3, %v1118_v20 }
 0x2a1   : > { %v1120_v5 = vpop.permute.xlu0 %1119 }
 0x2a2   : > { %1175 = vst.msk [vmem:[%s1696_s29 + $0xa0] sm:$0xff] %vm1154_vm3, %v1120_v5 }
 0x2a5   : > { %v1122_v22 = vpop.permute.xlu1 %1121 }
 0x2a6   : > { %1176 = vst.msk [vmem:[%s1696_s29 + $0xa8] sm:$0xff] %vm1154_vm3, %v1122_v22 }
 0x2a9   : > { %v1124_v19 = vpop.permute.xlu0 %1123 }
 0x2aa   : > { %1177 = vst.msk [vmem:[%s1696_s29 + $0xb0] sm:$0xff] %vm1154_vm3, %v1124_v19 }
 0x2ad   : > { %v1126_v6 = vpop.permute.xlu1 %1125 }
 0x2ae   : > { %1178 = vst.msk [vmem:[%s1696_s29 + $0xb8] sm:$0xff] %vm1154_vm3, %v1126_v6 }
 0x2b1   : > { %v1128_v8 = vpop.permute.xlu0 %1127 }
 0x2b2   : > { %1179 = vst.msk [vmem:[%s1696_s29 + $0xc0] sm:$0xff] %vm1154_vm3, %v1128_v8 }
 0x2b3 PF: > { %s15_s18 = sadd.s32 1, %s1636_s18  }
 0x2b4   : > { %p12_p4 = scmp.ge.s32.totalorder %s15_s18, 7  }
 0x2b6   :  { %14 = sbr.rel (!%p12_p4) target bundleno = 1 (0x1), region = 70 }

</bundles_post_ra>
